<compile_context>
chip_gen: v5e
topology: v5e:2x2
jax: 0.10.0
libtpu: 0.0.40
codegen_flags: <defaults>
</compile_context>

<pallas_src>
import functools

import jax
import jax.numpy as jnp
from jax.experimental import pallas as pl
from jax.experimental.pallas import tpu as pltpu


# One f32 (row_tile, V) tile worth of data kept <= 2 MiB so that the
# double-buffered inputs plus the compiler's elementwise temporaries stay well
# under the VMEM budget on every generation (v7x has only 64 MiB physical).
_F32_TILE_BUDGET_BYTES = 2 * 1024 * 1024
_VMEM_LIMIT_BYTES = 48 * 1024 * 1024  # safe on v5e/v6e (128 MiB) and v7x (64 MiB)


def _choose_row_tile(n_rows, vocab, itemsize):
    """Largest row tile that (a) fits the VMEM budget, (b) respects sublane packing."""
    sublane = {4: 8, 2: 16, 1: 32}.get(itemsize, 8)
    rt = _F32_TILE_BUDGET_BYTES // max(1, vocab * 4)
    rt = max(sublane, min(rt, 1024))
    rt = (rt // sublane) * sublane
    # Never larger than the row count rounded up to the sublane multiple.
    n_round = max(sublane, ((n_rows + sublane - 1) // sublane) * sublane)
    return max(sublane, min(rt, n_round))


def _kl_div_kernel(x_ref, t_ref, out_ref, *, n_rows, row_tile, mask_rows):
    """Processes one (row_tile, V) tile; writes a scalar partial sum slab.

    x_ref   : (row_tile, V) input logits tile
    t_ref   : (row_tile, V) target logits tile
    out_ref : (1, 8, 128)   lane-dense per-tile partial-sum slab
    """
    x = x_ref[...].astype(jnp.float32)
    t = t_ref[...].astype(jnp.float32)

    if mask_rows:
        # Tail tile: rows past n_rows contain undefined data. Zero them BEFORE
        # any exp/log so garbage can never produce Inf/NaN (zero rows give a
        # uniform distribution on both sides -> exact 0 KL contribution).
        row0 = pl.program_id(0) * row_tile
        rid = jax.lax.broadcasted_iota(jnp.int32, (row_tile, 1), 0)
        valid = (rid + row0) < n_rows          # (row_tile, 1) bool
        x = jnp.where(valid, x, 0.0)
        t = jnp.where(valid, t, 0.0)

    # log-sum-exp of the input logits (for log_softmax(input)).
    x_max = jnp.max(x, axis=-1, keepdims=True)
    x_shift = x - x_max
    x_lse = jnp.log(jnp.sum(jnp.exp(x_shift), axis=-1, keepdims=True))

    # softmax pieces of the target logits.
    t_max = jnp.max(t, axis=-1, keepdims=True)
    t_shift = t - t_max
    t_exp = jnp.exp(t_shift)
    t_sum = jnp.sum(t_exp, axis=-1, keepdims=True)

    # Fused per-row KL (since sum_v q == 1):
    #   sum_v q*(log q - log p)
    #     = sum_v t_exp*(t_shift - x_shift) / t_sum + x_lse - log(t_sum)
    cross = jnp.sum(t_exp * (t_shift - x_shift), axis=-1, keepdims=True)
    row_kl = cross / t_sum + (x_lse - jnp.log(t_sum))      # (row_tile, 1)

    if mask_rows:
        row_kl = jnp.where(valid, row_kl, 0.0)

    partial = jnp.sum(row_kl)                              # scalar for this tile
    out_ref[...] = jnp.broadcast_to(partial.astype(jnp.float32), out_ref.shape)


def kl_div_loss(input_logits, target_logits, *, row_tile=None):
    """Pallas equivalent of KLDivLoss.forward(input, target) ('batchmean')."""
    assert input_logits.shape == target_logits.shape
    shape = input_logits.shape
    batch_size = shape[0]          # PyTorch 'batchmean' divides by the first dim
    V = shape[-1]
    N = 1
    for d in shape[:-1]:
        N *= d

    x2 = input_logits.reshape(N, V)
    t2 = target_logits.reshape(N, V)

    itemsize = jnp.dtype(input_logits.dtype).itemsize
    if row_tile is None:
        row_tile = _choose_row_tile(N, V, itemsize)

    num_tiles = pl.cdiv(N, row_tile)
    mask_rows = (N % row_tile) != 0

    kernel = functools.partial(
        _kl_div_kernel, n_rows=N, row_tile=row_tile, mask_rows=mask_rows
    )

    # TODO(synk): for very large V (>= 32K) add a second grid axis over V with an
    # online logsumexp so row_tile can stay large within v7x's 64 MiB VMEM.
    partials = pl.pallas_call(
        kernel,
        out_shape=jax.ShapeDtypeStruct((num_tiles, 8, 128), jnp.float32),
        grid_spec=pltpu.PrefetchScalarGridSpec(
            num_scalar_prefetch=0,
            grid=(num_tiles,),
            in_specs=[
                pl.BlockSpec((row_tile, V), lambda i: (i, 0)),
                pl.BlockSpec((row_tile, V), lambda i: (i, 0)),
            ],
            out_specs=pl.BlockSpec((1, 8, 128), lambda i: (i, 0, 0)),
        ),
        compiler_params=pltpu.CompilerParams(
            dimension_semantics=("parallel",),
            vmem_limit_bytes=_VMEM_LIMIT_BYTES,
        ),
    )(x2, t2)

    # Per-tile partial sums -> total sum -> 'batchmean'.
    return jnp.sum(partials[:, 0, 0]) / jnp.float32(batch_size)


def _kl_div_ref(input_logits, target_logits):
    """Pure-JAX reference matching the PyTorch module."""
    log_p = jax.nn.log_softmax(input_logits, axis=-1)
    q = jax.nn.softmax(target_logits, axis=-1)
    log_q = jax.nn.log_softmax(target_logits, axis=-1)
    per_elem = q * (log_q - log_p)
    return jnp.sum(per_elem) / input_logits.shape[0]


if __name__ == "__main__":
    key = jax.random.PRNGKey(0)
    k1, k2, k3, k4 = jax.random.split(key, 4)

    # Case 1: batch=2, seq=8, vocab/hidden=32; softmax over the last dim.
    B, S, V = 2, 8, 32
    input_logits = jax.random.normal(k1, (B, S, V), dtype=jnp.float32)
    target_logits = jax.random.normal(k2, (B, S, V), dtype=jnp.float32)

    loss = jax.block_until_ready(kl_div_loss(input_logits, target_logits))
    ref = _kl_div_ref(input_logits, target_logits)
    assert jnp.allclose(loss, ref, rtol=1e-5, atol=1e-5), (loss, ref)

    # Case 2: row count not a multiple of the tile -> exercises the in-kernel mask.
    B2, S2 = 2, 13
    in2 = jax.random.normal(k3, (B2, S2, V), dtype=jnp.float32)
    tg2 = jax.random.normal(k4, (B2, S2, V), dtype=jnp.float32)
    loss2 = jax.block_until_ready(kl_div_loss(in2, tg2))
    ref2 = _kl_div_ref(in2, tg2)
    assert jnp.allclose(loss2, ref2, rtol=1e-5, atol=1e-5), (loss2, ref2)

    print("KERNEL_OK")
</pallas_src>

<mosaic_0001>
module attributes {stable_mosaic.version = 11 : i64} {
  func.func @_kl_div_kernel(%arg0: i32, %arg1: memref<16x32xf32, #tpu.memory_space<vmem>>, %arg2: memref<16x32xf32, #tpu.memory_space<vmem>>, %arg3: memref<1x8x128xf32, #tpu.memory_space<vmem>>) attributes {dimension_semantics = [#tpu.dimension_semantics<parallel>], iteration_bounds = array<i64: 1>, scalar_prefetch = 0 : i64, scratch_operands = 0 : i64, tpu.core_type = #tpu.core_type<tc>, window_params = [{transform_indices = @transform_0, window_bounds = array<i64: 16, 32>}, {transform_indices = @transform_1, window_bounds = array<i64: 16, 32>}, {transform_indices = @transform_2, window_bounds = array<i64: 1, 8, 128>}]} {
    %c0 = arith.constant 0 : index
    %c0_0 = arith.constant 0 : index
    %0 = vector.load %arg1[%c0, %c0_0] : memref<16x32xf32, #tpu.memory_space<vmem>>, vector<16x32xf32>
    %c0_1 = arith.constant 0 : index
    %c0_2 = arith.constant 0 : index
    %1 = vector.load %arg2[%c0_1, %c0_2] : memref<16x32xf32, #tpu.memory_space<vmem>>, vector<16x32xf32>
    %cst = arith.constant dense<0xFF800000> : vector<16xf32>
    %2 = vector.multi_reduction <maximumf>, %0, %cst [1] : vector<16x32xf32> to vector<16xf32>
    %3 = vector.shape_cast %2 : vector<16xf32> to vector<16x1xf32>
    %4 = vector.broadcast %3 : vector<16x1xf32> to vector<16x32xf32>
    %5 = arith.subf %0, %4 : vector<16x32xf32>
    %6 = math.exp %5 : vector<16x32xf32>
    %cst_3 = arith.constant dense<0.000000e+00> : vector<16xf32>
    %7 = vector.multi_reduction <add>, %6, %cst_3 [1] : vector<16x32xf32> to vector<16xf32>
    %8 = vector.shape_cast %7 : vector<16xf32> to vector<16x1xf32>
    %9 = math.log %8 : vector<16x1xf32>
    %cst_4 = arith.constant dense<0xFF800000> : vector<16xf32>
    %10 = vector.multi_reduction <maximumf>, %1, %cst_4 [1] : vector<16x32xf32> to vector<16xf32>
    %11 = vector.shape_cast %10 : vector<16xf32> to vector<16x1xf32>
    %12 = vector.broadcast %11 : vector<16x1xf32> to vector<16x32xf32>
    %13 = arith.subf %1, %12 : vector<16x32xf32>
    %14 = math.exp %13 : vector<16x32xf32>
    %cst_5 = arith.constant dense<0.000000e+00> : vector<16xf32>
    %15 = vector.multi_reduction <add>, %14, %cst_5 [1] : vector<16x32xf32> to vector<16xf32>
    %16 = vector.shape_cast %15 : vector<16xf32> to vector<16x1xf32>
    %17 = arith.subf %13, %5 : vector<16x32xf32>
    %18 = arith.mulf %14, %17 : vector<16x32xf32>
    %cst_6 = arith.constant dense<0.000000e+00> : vector<16xf32>
    %19 = vector.multi_reduction <add>, %18, %cst_6 [1] : vector<16x32xf32> to vector<16xf32>
    %20 = vector.shape_cast %19 : vector<16xf32> to vector<16x1xf32>
    %21 = arith.divf %20, %16 : vector<16x1xf32>
    %22 = math.log %16 : vector<16x1xf32>
    %23 = arith.subf %9, %22 : vector<16x1xf32>
    %24 = arith.addf %21, %23 : vector<16x1xf32>
    %25 = vector.shape_cast %24 : vector<16x1xf32> to vector<1x16x1xf32>
    %cst_7 = arith.constant dense<0.000000e+00> : vector<1xf32>
    %26 = vector.multi_reduction <add>, %25, %cst_7 [1, 2] : vector<1x16x1xf32> to vector<1xf32>
    %27 = vector.shape_cast %26 : vector<1xf32> to vector<1x1x1xf32>
    %28 = vector.extract %27[0, 0, 0] : f32 from vector<1x1x1xf32>
    %29 = vector.broadcast %28 : f32 to vector<1x8x128xf32>
    %c0_8 = arith.constant 0 : index
    %c0_9 = arith.constant 0 : index
    %c0_10 = arith.constant 0 : index
    %30 = vector.load %arg3[%c0_8, %c0_9, %c0_10] : memref<1x8x128xf32, #tpu.memory_space<vmem>>, vector<1x8x128xf32>
    tpu.vector_store %arg3[%c0_8, %c0_9, %c0_10], %29 {strides = array<i32>} : memref<1x8x128xf32, #tpu.memory_space<vmem>>, vector<1x8x128xf32>,
    return
  }
  func.func @transform_0(%arg0: i32) -> (i32, i32) {
    %c0_i32 = arith.constant 0 : i32
    %c0_i32_0 = arith.constant 0 : i32
    return %arg0, %c0_i32 : i32, i32
  }
  func.func @transform_1(%arg0: i32) -> (i32, i32) {
    %c0_i32 = arith.constant 0 : i32
    %c0_i32_0 = arith.constant 0 : i32
    return %arg0, %c0_i32 : i32, i32
  }
  func.func @transform_2(%arg0: i32) -> (i32, i32, i32) {
    %c0_i32 = arith.constant 0 : i32
    %c0_i32_0 = arith.constant 0 : i32
    %c0_i32_1 = arith.constant 0 : i32
    return %arg0, %c0_i32, %c0_i32_0 : i32, i32, i32
  }
}

</mosaic_0001>

<bundles_post_ra>
// kernel: tpu_custom_call.1
= control target key start
LH: loop header
LB: loop body
LE: loop exit
PB: predicated region body
PF: predicated region fallthrough
CT: control target
= control target key end

     0   :  { %7 = vsyncpa [#allocation3], 0  ;;  %s314_s0 = inlined_call_operand.hbm [shape: f32[16,32], index: 0, kind: input, shape index: {}]   ;;  %s315_s1 = inlined_call_operand.hbm [shape: f32[16,32], index: 1, kind: input, shape index: {}]   ;;  %s316_s2 = inlined_call_operand.hbm [shape: f32[1,8,128], index: 2, kind: output, shape index: {}]  }
   0x1   :  { %8 = vsyncpa [#allocation6], 0 }
   0x2   :  { %9 = vsyncpa [#allocation4], 0  ;;  %s14_s11 = sshll.u32 %s314_s0, 4  ;;  %s275_s12 = smov [#allocation2]   ;;  %s15_s11 = int_to_ptr.hbm [resolvable:$true] %s14_s11 }
   0x3   :  { %s16_s13 = sshll.u32 %s275_s12, 4  ;;  %s27_s16 = sshll.u32 %s315_s1, 4  ;;  %s17_s13 = int_to_ptr.vmem [resolvable:$true] %s16_s13  ;;  %s28_s16 = int_to_ptr.hbm [resolvable:$true] %s27_s16 }
   0x4   :  { %s276_s17 = smov 128   ;;  %s277_s18 = smov 8  }
   0x5   :  { %22 = dma.hbm_to_vmem [thread:$0]  %s15_s11, 256, %s17_s13, [#allocation3], %s276_s17, %s276_s17, %s277_s18  }
   0x6   :  { %s278_s19 = smov [#allocation5]  }
   0x7   :  { %s29_s20 = sshll.u32 %s278_s19, 4  ;;  %s30_s20 = int_to_ptr.vmem [resolvable:$true] %s29_s20 }
   0x8   :  { %35 = dma.hbm_to_vmem [thread:$0]  %s28_s16, 256, %s30_s20, [#allocation6], %s276_s17, %s276_s17, %s277_s18  }
   0x9   :  { %269 = dma.done.wait [#allocation3], 256  }
   0xa   :  { %270 = vsyncadd [#allocation3], 4294967040 }
   0xb   :  { %271 = dma.done.wait [#allocation6], 256  }
   0xc   :  { %272 = vsyncadd [#allocation6], 4294967040  ;;  %vm48_vm0 = vcmask 261120   ;;  %v46_v0 = vld [vmem:[#allocation5] sm:$0xff]  ;;  %v44_v1 = vld [vmem:[#allocation2] sm:$0xff]  ;;  %vm137_vm9 = vcmask 7168  }
   0xd   :  { %v71_v2 = vsel %vm48_vm0, %v46_v0, -inf  ;;  %v49_v3 = vsel %vm48_vm0, %v44_v1, -inf  ;;  %v47_v4 = vld [vmem:[#allocation5 + $0x8] sm:$0xff]  ;;  %v45_v5 = vld [vmem:[#allocation2 + $0x8] sm:$0xff]  ;;  %s159_s21 = sshll.u32 %s316_s2, 4  ;;  %s279_s22 = smov [#allocation7]   ;;  %s160_s21 = int_to_ptr.hbm [resolvable:$true] %s159_s21 }
   0xe   :  { %72 = vmax.xlane.f32.xlu0 %v71_v2  ;;  %50 = vmax.xlane.f32.xlu1 %v49_v3  ;;  %v74_v6 = vsel %vm48_vm0, %v47_v4, -inf  ;;  %v52_v7 = vsel %vm48_vm0, %v45_v5, -inf  ;;  %s157_s23 = sshll.u32 %s279_s22, 4  ;;  %s158_s23 = int_to_ptr.vmem [resolvable:$true] %s157_s23 }
  0x16   :  { %75 = vmax.xlane.f32.xlu0 %v74_v6  ;;  %53 = vmax.xlane.f32.xlu1 %v52_v7 }
  0x81   :  { %v73_v8 = vpop.xlane.xlu0 %72  ;;  %v51_v9 = vpop.xlane.xlu1 %50 }
  0x82   :  { %v77_v10 = vsub.f32 %v46_v0, %v73_v8  ;;  %v55_v11 = vsub.f32 %v44_v1, %v51_v9 }
  0x84   :  { %v79_v12 = vmul.f32 1.442695, %v77_v10  ;;  %v57_v13 = vmul.f32 1.442695, %v55_v11  ;;  %v89_v30 = vsub.f32 %v77_v10, %v55_v11 }
  0x86   :  { %177 = vpow2.f32 %v79_v12 }
  0x87   :  { %179 = vpow2.f32 %v57_v13 }
  0x89   :  { %v76_v14 = vpop.xlane.xlu0 %75  ;;  %v54_v15 = vpop.xlane.xlu1 %53 }
  0x8a   :  { %v78_v16 = vsub.f32 %v47_v4, %v76_v14  ;;  %v56_v17 = vsub.f32 %v45_v5, %v54_v15 }
  0x8c   :  { %v178_v18 = vpop.eup %177  ;;  %v81_v19 = vmul.f32 1.442695, %v78_v16  ;;  %v59_v20 = vmul.f32 1.442695, %v56_v17  ;;  %v90_v24 = vsub.f32 %v78_v16, %v56_v17 }
  0x8d   :  { %v180_v21 = vpop.eup %179  ;;  %v83_v22 = vsel %vm48_vm0, %v178_v18, 0.0  ;;  %v91_v32 = vmul.f32 %v178_v18, %v89_v30 }
  0x8e   :  { %181 = vpow2.f32 %v81_v19  ;;  %84 = vadd.xlane.f32.xlu2 %v83_v22  ;;  %v61_v23 = vsel %vm48_vm0, %v180_v21, 0.0 }
  0x8f   :  { %183 = vpow2.f32 %v59_v20  ;;  %62 = vadd.xlane.f32.xlu0 %v61_v23  ;;  %v93_v33 = vsel %vm48_vm0, %v91_v32, 0.0 }
  0x94   :  { %v182_v25 = vpop.eup %181 }
  0x95   :  { %v184_v26 = vpop.eup %183  ;;  %v86_v27 = vsel %vm48_vm0, %v182_v25, 0.0  ;;  %v92_v28 = vmul.f32 %v182_v25, %v90_v24 }
  0x96   :  { %87 = vadd.xlane.f32.xlu2 %v86_v27  ;;  %v64_v29 = vsel %vm48_vm0, %v184_v26, 0.0 }
  0x97   :  { %65 = vadd.xlane.f32.xlu1 %v64_v29  ;;  %v96_v31 = vsel %vm48_vm0, %v92_v28, 0.0 }
  0x98   :  { %97 = vadd.xlane.f32.xlu0 %v96_v31 }
  0x9e   :  { %94 = vadd.xlane.f32.xlu2 %v93_v33 }
 0x101   :  { %v85_v34 = vpop.xlane.xlu2 %84 }
 0x102   :  { %185 = vrcp.f32 %v85_v34  ;;  %v63_v37 = vpop.xlane.xlu0 %62  ;;  %v110_v42 = vand.u32 2147483648, %v85_v34  ;;  %vm104_vm2 = vweird.f32 %v85_v34  ;;  %v108_v44 = vand.u32 2147483647, %v85_v34 }
 0x104   :  { %v111_v50 = vor.u32 1.1754944e-38, %v110_v42  ;;  %vm109_vm4 = vcmp.eq.f32.partialorder %v108_v44, 8.507059e+37 }
 0x108   :  { %v186_v35 = vpop.eup %185 }
 0x109   :  { %v100_v36 = vmul.f32 %v186_v35, %v85_v34  ;;  %v88_v38 = vpop.xlane.xlu2 %87  ;;  %vm105_vm1 = vweird.f32 %v186_v35 }
 0x10a   :  { %187 = vrcp.f32 %v88_v38  ;;  %v66_v39 = vpop.xlane.xlu1 %65  ;;  %vm106_vm3 = vmor %vm104_vm2, %vm105_vm1  ;;  %v125_v55 = vand.u32 2147483648, %v88_v38  ;;  %v123_v60 = vand.u32 2147483647, %v88_v38  ;;  %vm119_vm6 = vweird.f32 %v88_v38 }
 0x10b   :  { %189 = vlog2.f32 %v85_v34  ;;  %v101_v40 = vsub.f32 1.0, %v100_v36  ;;  %v98_v5 = vpop.xlane.xlu0 %97 }
 0x10c   :  { %191 = vlog2.f32 %v63_v37  ;;  %v126_v1 = vor.u32 1.1754944e-38, %v125_v55  ;;  %vm124_vm8 = vcmp.eq.f32.partialorder %v123_v60, 8.507059e+37 }
 0x10d   :  { %193 = vlog2.f32 %v88_v38  ;;  %v102_v41 = vmul.f32 %v186_v35, %v101_v40 }
 0x10e   :  { %195 = vlog2.f32 %v66_v39 }
 0x10f   :  { %v103_v43 = vadd.f32 %v186_v35, %v102_v41 }
 0x110   :  { %v188_v45 = vpop.eup %187 }
 0x111   :  { %v190_v46 = vpop.eup %189  ;;  %v115_v47 = vmul.f32 %v188_v45, %v88_v38  ;;  %v107_v48 = vsel %vm106_vm3, %v186_v35, %v103_v43  ;;  %v95_v57 = vpop.xlane.xlu2 %94  ;;  %vm120_vm5 = vweird.f32 %v188_v45 }
 0x112   :  { %v192_v49 = vpop.eup %191  ;;  %v130_v54 = vmul.f32 0.6931472, %v190_v46  ;;  %v112_v56 = vsel %vm109_vm4, %v111_v50, %v107_v48  ;;  %vm121_vm7 = vmor %vm119_vm6, %vm120_vm5 }
 0x113   :  { %v194_v51 = vpop.eup %193  ;;  %v116_v52 = vsub.f32 1.0, %v115_v47  ;;  %v68_v58 = vmul.f32 0.6931472, %v192_v49  ;;  %v113_v0 = vmul.f32 %v112_v56, %v95_v57 }
 0x114   :  { %v196_v53 = vpop.eup %195  ;;  %v132_v61 = vmul.f32 0.6931472, %v194_v51 }
 0x115   :  { %v117_v59 = vmul.f32 %v188_v45, %v116_v52  ;;  %v70_v62 = vmul.f32 0.6931472, %v196_v53  ;;  %v133_v2 = vsub.f32 %v68_v58, %v130_v54 }
 0x117   :  { %v118_v63 = vadd.f32 %v188_v45, %v117_v59  ;;  %v134_v6 = vsub.f32 %v70_v62, %v132_v61  ;;  %v135_v8 = vadd.f32 %v133_v2, %v113_v0 }
 0x119   :  { %v122_v3 = vsel %vm121_vm7, %v188_v45, %v118_v63  ;;  %v138_v10 = vsel %vm137_vm9, %v135_v8, 0.0 }
 0x11a   :  { %v127_v4 = vsel %vm124_vm8, %v126_v1, %v122_v3 }
 0x11b   :  { %v128_v7 = vmul.f32 %v127_v4, %v98_v5 }
 0x11d   :  { %v136_v9 = vadd.f32 %v134_v6, %v128_v7 }
 0x11f   :  { %v139_v11 = vsel %vm137_vm9, %v136_v9, 0.0 }
 0x120   :  { %v140_v12 = vadd.f32 %v139_v11, %v138_v10 }
 0x122   :  { %141 = vadd.xlane.f32.xlu1 %v140_v12 }
 0x195   :  { %v142_v13 = vpop.xlane.xlu1 %141 }
 0x196   :  { %v143_v14 = vrot.slane %v142_v13, 4 }
 0x198   :  { %v144_v15 = vadd.f32 %v143_v14, %v142_v13 }
 0x19a   :  { %v145_v16 = vrot.slane %v144_v15, 2 }
 0x19c   :  { %v146_v17 = vadd.f32 %v145_v16, %v144_v15 }
 0x19e   :  { %v147_v18 = vrot.slane %v146_v17, 1 }
 0x1a0   :  { %v148_v19 = vadd.f32 %v147_v18, %v146_v17 }
 0x1a2   :  { %170 = vpush %v148_v19 }
 0x1d3   :  { %s171_s24 = spop %170 }
 0x1d4   :  { %v150_v20 = vstv %s171_s24 }
 0x1d5   :  { %151 = vst [vmem:[#allocation7] sm:$0xff] %v150_v20 }
 0x1d6   :  { %162 = dma.vmem_to_hbm [thread:$0]  %s158_s23, 128, %s160_s21, [#allocation4]  }
 0x1d7   :  { %273 = dma.done.wait [#allocation4], 128  }
 0x1d8   :  { %274 = vsyncadd [#allocation4], 4294967168 }
 0x1d9   :  { %167 = vsyncpa [#allocation3], 1 }
 0x1da   :  { %168 = vsyncpa [#allocation6], 1 }
 0x1db   :  { %169 = vsyncpa [#allocation4], 1 }

</bundles_post_ra>
